<compile_context>
chip_gen: v7x
topology: tpu7x:2x2x1
jax: 0.10.0
libtpu: 0.0.40
codegen_flags: <defaults>
</compile_context>

<pallas_src>
import jax
import jax.numpy as jnp
from jax import lax
from jax.experimental import pallas as pl
from jax.experimental.pallas import tpu as pltpu

LANE = 128
SUBLANE = 8
LN_EPS = 1e-5


def _round_up(x, m):
    return (x + m - 1) // m * m


def _chip_info():
    """(vmem_capacity_bytes, is_v5, multi_tensorcore) with safe fallbacks."""
    kind = ""
    try:
        kind = jax.devices()[0].device_kind.lower()
    except Exception:
        pass
    vmem_cap = None
    try:
        vmem_cap = int(pltpu.get_tpu_info().vmem_capacity_bytes)
    except Exception:
        vmem_cap = None
    if vmem_cap is None:
        vmem_cap = (64 << 20) if "v7" in kind else (128 << 20)
    is_v5 = "v5" in kind
    multi_tc = ("v7" in kind) or vmem_cap <= (64 << 20)
    return vmem_cap, is_v5, multi_tc


def _tile_candidates(n):
    """Multiples of 8 that divide n (n is already a multiple of 8)."""
    return [t for t in range(SUBLANE, n + 1, SUBLANE) if n % t == 0]


def _pick_tiles(np_, per_pair_bytes, fixed_bytes, budget_bytes, cap_ti=None):
    """Largest (TI, TJ) pair tiles whose working set fits the budget."""
    cands = _tile_candidates(np_)
    best = (cands[0], cands[0])
    best_prod = 0
    for ti in cands:
        if cap_ti is not None and ti > cap_ti and cands[0] <= cap_ti:
            continue  # keep >= 2 i-steps so both TensorCores get work
        for tj in cands:
            prod = ti * tj
            if fixed_bytes + prod * per_pair_bytes <= budget_bytes and prod > best_prod:
                best, best_prod = (ti, tj), prod
    return best


def decode2_pallas(v, params, mm_dtype=jnp.bfloat16):
    B, N, D = v.shape
    F_out = params["w4"].shape[1]
    f32 = jnp.float32

    Np = _round_up(max(N, SUBLANE), SUBLANE)       # padded node count
    Dp = _round_up(max(D, LANE), LANE)             # padded hidden dim
    Fp = _round_up(max(F_out, LANE), LANE)         # matmul (lane) width of l4
    Sp = max(Dp, Fp)                               # lane width of packed biases
    inv_d = 1.0 / float(D)
    pad_cols = float(Dp - D)

    vmem_cap, is_v5, multi_tc = _chip_info()
    mm_np = jnp.dtype(mm_dtype)
    mm_bytes = mm_np.itemsize
    # bf16 elementwise pair construction only where the VPU is bf16-native.
    pair_dtype = f32 if (is_v5 or mm_np == jnp.dtype(f32)) else mm_dtype
    pair_bytes = jnp.dtype(pair_dtype).itemsize

    small_vmem = vmem_cap <= (64 << 20)            # v7x-class
    tile_budget = (13 << 20) if small_vmem else (48 << 20)
    limit_cap = (48 << 20) if small_vmem else (100 << 20)

    # per (i,j) pair element live bytes in the (heavier) output kernel:
    #   pair + ~4 f32 temporaries (e, e2, e5/d, y) + l4 result + 2x output buf
    fo_store = _round_up(F_out, LANE)              # lane-padded VMEM store width
    per_pair = Dp * (16 + pair_bytes) + 4 * Fp + 8 * fo_store
    fixed = (6 * Np * Dp * 4                       # v1/v2/e_v full blocks (x2 bufs)
             + 2 * (Dp * Dp + Dp * Fp) * mm_bytes  # w2 / w4
             + 2 * SUBLANE * Sp * 4)               # packed small operands
    # TODO(synk): for extremely large N (Np*Dp full blocks no longer small),
    # stream v1/v2/e_v as per-tile inputs instead of resident full blocks.

    cap_ti = Np // 2 if (multi_tc and B == 1 and Np >= 2 * SUBLANE) else None
    TI, TJ = _pick_tiles(Np, per_pair, fixed, tile_budget, cap_ti)
    NI, NJ = Np // TI, Np // TJ

    est = fixed + TI * TJ * per_pair
    vmem_limit = int(min(max(int(1.5 * est), 32 << 20), limit_cap))

    # ---- padded / pre-cast parameters and input -----------------------------
    def pad2(w, r, c, dt):
        return jnp.zeros((r, c), f32).at[:w.shape[0], :w.shape[1]].set(w).astype(dt)

    def pad1(x, c):
        return jnp.zeros((c,), f32).at[:x.shape[0]].set(x)

    v_p = jnp.zeros((B, Np, Dp), f32).at[:, :N, :D].set(v)
    # fused l1: one (Dp, 2*Dp) matmul; 256-wide output matches v6e/v7x MXU tile
    w1 = jnp.concatenate([pad2(params["w1_sum"], Dp, Dp, mm_dtype),
                          pad2(params["w1_prod"], Dp, Dp, mm_dtype)], axis=1)
    w2 = pad2(params["w2"], Dp, Dp, mm_dtype)
    w3 = pad2(params["w3"], Dp, Dp, mm_dtype)
    w4 = pad2(params["w4"], Dp, Fp, mm_dtype)
    # packed small f32 operands, rows: b1_sum, b1_prod, b2, b3, gamma, beta, b4, 0
    small = jnp.stack([
        pad1(params["b1_sum"], Sp), pad1(params["b1_prod"], Sp),
        pad1(params["b2"], Sp), pad1(params["b3"], Sp),
        pad1(params["gamma"], Sp), pad1(params["beta"], Sp),
        pad1(params["b4"], Sp), jnp.zeros((Sp,), f32)], axis=0)

    def mm(x, w):  # weights are already mm_dtype; accumulate in f32
        return jnp.dot(x.astype(mm_dtype), w, preferred_element_type=jnp.float32)

    # ---- kernel 1: fused per-node transforms v1 / v2 ------------------------
    def node_kernel(v_ref, w1_ref, sm_ref, v1_ref, v2_ref):
        sm = sm_ref[...]
        h = mm(v_ref[0], w1_ref[...])                       # (Np, 2*Dp), f32
        v1_ref[0] = jnp.maximum(h[:, :Dp] + sm[0:1, :Dp], 0.0)
        v2_ref[0] = jnp.maximum(h[:, Dp:] + sm[1:2, :Dp], 0.0)

    # ---- kernel 2: e_v = relu(l3(max_j relu(l2(pair)))), j-tiled running max
    def ev_kernel(v1_ref, v2_ref, w2_ref, w3_ref, sm_ref, ev_ref):
        j = pl.program_id(2)
        sm = sm_ref[...]
        ri = pl.multiple_of(pl.program_id(1) * TI, SUBLANE)
        rj = pl.multiple_of(j * TJ, SUBLANE)
        a_i = v1_ref[0, pl.ds(ri, TI), :].astype(pair_dtype)
        p_i = v2_ref[0, pl.ds(ri, TI), :].astype(pair_dtype)
        a_j = v1_ref[0, pl.ds(rj, TJ), :].astype(pair_dtype)
        p_j = v2_ref[0, pl.ds(rj, TJ), :].astype(pair_dtype)
        pair = (a_i[:, None, :] + a_j[None, :, :]
                + p_i[:, None, :] * p_j[None, :, :])        # (TI, TJ, Dp)
        e = jnp.maximum(mm(pair.reshape(TI * TJ, Dp), w2_ref[...])
                        + sm[2:3, :Dp], 0.0).reshape(TI, TJ, Dp)
        if Np != N:
            # padded j columns must not win the max (e >= 0, so 0 is neutral)
            jj = lax.broadcasted_iota(jnp.int32, (TJ, Dp), 0) + rj
            e = jnp.where((jj < N)[None, :, :], e, 0.0)
        m = jnp.max(e, axis=1)                              # (TI, Dp)

        @pl.when(j == 0)
        def _():
            ev_ref[0] = m

        @pl.when(j > 0)
        def _():
            ev_ref[0] = jnp.maximum(ev_ref[0], m)

        @pl.when(j == NJ - 1)
        def _():
            ev_ref[0] = jnp.maximum(mm(ev_ref[0], w3_ref[...]) + sm[3:4, :Dp], 0.0)

    # ---- kernel 3: recompute e, finish e2 / LayerNorm / l4 per (i, j) tile --
    def out_kernel(v1_ref, v2_ref, ev_ref, w2_ref, w4_ref, sm_ref, out_ref):
        sm = sm_ref[...]
        ri = pl.multiple_of(pl.program_id(1) * TI, SUBLANE)
        rj = pl.multiple_of(pl.program_id(2) * TJ, SUBLANE)
        a_i = v1_ref[0, pl.ds(ri, TI), :].astype(pair_dtype)
        p_i = v2_ref[0, pl.ds(ri, TI), :].astype(pair_dtype)
        a_j = v1_ref[0, pl.ds(rj, TJ), :].astype(pair_dtype)
        p_j = v2_ref[0, pl.ds(rj, TJ), :].astype(pair_dtype)
        ev_i = ev_ref[0, pl.ds(ri, TI), :]
        ev_j = ev_ref[0, pl.ds(rj, TJ), :]
        pair = (a_i[:, None, :] + a_j[None, :, :]
                + p_i[:, None, :] * p_j[None, :, :])        # (TI, TJ, Dp)
        e = jnp.maximum(mm(pair.reshape(TI * TJ, Dp), w2_ref[...])
                        + sm[2:3, :Dp], 0.0)                # (TI*TJ, Dp) f32
        e2 = jnp.maximum(ev_i[:, None, :] + ev_j[None, :, :], 0.0)
        e5 = e + e2.reshape(TI * TJ, Dp)
        # two-pass LayerNorm over the real D columns (padded columns are 0;
        # they contribute exactly pad_cols * mu^2 to sum((e5-mu)^2))
        mu = jnp.sum(e5, axis=-1, keepdims=True) * inv_d
        d = e5 - mu
        var = (jnp.sum(d * d, axis=-1, keepdims=True) - pad_cols * mu * mu) * inv_d
        y = d * lax.rsqrt(var + LN_EPS) * sm[4:5, :Dp] + sm[5:6, :Dp]
        o = mm(y, w4_ref[...]) + sm[6:7, :Fp]               # (TI*TJ, Fp)
        out_ref[0] = o[:, :F_out].reshape(TI, TJ, F_out)    # compact feature store

    # ---- specs / compiler params --------------------------------------------
    full_spec = pl.BlockSpec((1, Np, Dp), lambda b, i, j: (b, 0, 0))

    def fixed_spec3(r, c):
        return pl.BlockSpec((r, c), lambda b, i, j: (0, 0))

    cp1 = pltpu.CompilerParams(dimension_semantics=("parallel",),
                               vmem_limit_bytes=vmem_limit)
    cp_ev = pltpu.CompilerParams(
        dimension_semantics=("parallel", "parallel", "arbitrary"),
        vmem_limit_bytes=vmem_limit)
    cp_out = pltpu.CompilerParams(
        dimension_semantics=("parallel", "parallel", "parallel"),
        vmem_limit_bytes=vmem_limit)

    v1, v2 = pl.pallas_call(
        node_kernel,
        out_shape=(jax.ShapeDtypeStruct((B, Np, Dp), f32),
                   jax.ShapeDtypeStruct((B, Np, Dp), f32)),
        grid_spec=pltpu.PrefetchScalarGridSpec(
            num_scalar_prefetch=0, grid=(B,),
            in_specs=[pl.BlockSpec((1, Np, Dp), lambda b: (b, 0, 0)),
                      pl.BlockSpec((Dp, 2 * Dp), lambda b: (0, 0)),
                      pl.BlockSpec((SUBLANE, Sp), lambda b: (0, 0))],
            out_specs=(pl.BlockSpec((1, Np, Dp), lambda b: (b, 0, 0)),
                       pl.BlockSpec((1, Np, Dp), lambda b: (b, 0, 0)))),
        compiler_params=cp1,
    )(v_p, w1, small)

    e_v = pl.pallas_call(
        ev_kernel,
        out_shape=jax.ShapeDtypeStruct((B, Np, Dp), f32),
        grid_spec=pltpu.PrefetchScalarGridSpec(
            num_scalar_prefetch=0, grid=(B, NI, NJ),
            in_specs=[full_spec, full_spec,
                      fixed_spec3(Dp, Dp), fixed_spec3(Dp, Dp),
                      fixed_spec3(SUBLANE, Sp)],
            out_specs=pl.BlockSpec((1, TI, Dp), lambda b, i, j: (b, i, 0))),
        compiler_params=cp_ev,
    )(v1, v2, w2, w3, small)

    out = pl.pallas_call(
        out_kernel,
        out_shape=jax.ShapeDtypeStruct((B, Np, Np, F_out), f32),
        grid_spec=pltpu.PrefetchScalarGridSpec(
            num_scalar_prefetch=0, grid=(B, NI, NJ),
            in_specs=[full_spec, full_spec, full_spec,
                      fixed_spec3(Dp, Dp), fixed_spec3(Dp, Fp),
                      fixed_spec3(SUBLANE, Sp)],
            out_specs=pl.BlockSpec((1, TI, TJ, F_out),
                                   lambda b, i, j: (b, i, j, 0))),
        compiler_params=cp_out,
    )(v1, v2, e_v, w2, w4, small)

    if Np != N:
        out = out[:, :N, :N, :]
    return out


def decode2_ref(v, p):
    """Pure-JAX reference mirroring the PyTorch Decode2.forward."""
    v1 = jax.nn.relu(v @ p["w1_sum"] + p["b1_sum"])
    v2 = jax.nn.relu(v @ p["w1_prod"] + p["b1_prod"])
    e = v1[:, :, None, :] + v1[:, None, :, :]
    e = e + v2[:, :, None, :] * v2[:, None, :, :]
    e = jax.nn.relu(e @ p["w2"] + p["b2"])
    e_v = jnp.max(e, axis=2)
    e_v = jax.nn.relu(e_v @ p["w3"] + p["b3"])
    e2 = jax.nn.relu(e_v[:, :, None, :] + e_v[:, None, :, :])
    e5 = e + e2
    mu = e5.mean(-1, keepdims=True)
    var = ((e5 - mu) ** 2).mean(-1, keepdims=True)
    e5n = (e5 - mu) / jnp.sqrt(var + LN_EPS) * p["gamma"] + p["beta"]
    return e5n @ p["w4"] + p["b4"]


def init_params(key, D, F_out):
    ks = jax.random.split(key, 10)
    s = 1.0 / jnp.sqrt(D)
    u = lambda k, shape: jax.random.uniform(k, shape, jnp.float32, -s, s)
    return {
        # weights stored transposed as (in, out): forward does x @ W + b
        "w1_sum": u(ks[0], (D, D)), "b1_sum": u(ks[1], (D,)),
        "w1_prod": u(ks[2], (D, D)), "b1_prod": u(ks[3], (D,)),
        "w2": u(ks[4], (D, D)), "b2": u(ks[5], (D,)),
        "w3": u(ks[6], (D, D)), "b3": u(ks[7], (D,)),
        "w4": u(ks[8], (D, F_out)), "b4": u(ks[9], (F_out,)),
        "gamma": jnp.ones((D,), jnp.float32),
        "beta": jnp.zeros((D,), jnp.float32),
    }


if __name__ == "__main__":
    # N not a multiple of 8 on purpose: exercises the pad-masking paths.
    B, N, D, F_out = 2, 10, 32, 4
    key = jax.random.PRNGKey(0)
    kv, kp = jax.random.split(key)

    v = jax.random.normal(kv, (B, N, D), jnp.float32)
    params = init_params(kp, D, F_out)
    ref = decode2_ref(v, params)

    # strict-precision path (f32 matmuls): exact check against the reference
    out_f32 = jax.block_until_ready(decode2_pallas(v, params, mm_dtype=jnp.float32))
    assert out_f32.shape == (B, N, N, F_out)
    err = float(jnp.max(jnp.abs(out_f32 - ref)))
    assert jnp.allclose(out_f32, ref, rtol=1e-4, atol=1e-4), f"f32 max abs err {err}"

    # default fast path (bf16 matmuls, f32 accumulation): loose check
    out = jax.block_until_ready(decode2_pallas(v, params))
    assert out.shape == (B, N, N, F_out)
    rel = float(jnp.linalg.norm(out - ref) / (jnp.linalg.norm(ref) + 1e-12))
    assert rel < 5e-2, f"bf16 relative L2 error {rel}"

    print("KERNEL_OK")
</pallas_src>

<mosaic_0001>
module attributes {stable_mosaic.version = 11 : i64} {
  func.func @node_kernel(%arg0: i32, %arg1: memref<1x16x128xf32, #tpu.memory_space<vmem>>, %arg2: memref<128x256xf32, #tpu.memory_space<vmem>>, %arg3: memref<8x128xf32, #tpu.memory_space<vmem>>, %arg4: memref<1x16x128xf32, #tpu.memory_space<vmem>>, %arg5: memref<1x16x128xf32, #tpu.memory_space<vmem>>) attributes {dimension_semantics = [#tpu.dimension_semantics<parallel>], iteration_bounds = array<i64: 2>, scalar_prefetch = 0 : i64, scratch_operands = 0 : i64, tpu.core_type = #tpu.core_type<tc>, window_params = [{transform_indices = @transform_0, window_bounds = array<i64: 1, 16, 128>}, {pipeline_mode = #tpu.pipeline_mode<synchronous>, transform_indices = @transform_1, window_bounds = array<i64: 128, 256>}, {pipeline_mode = #tpu.pipeline_mode<synchronous>, transform_indices = @transform_2, window_bounds = array<i64: 8, 128>}, {transform_indices = @transform_3, window_bounds = array<i64: 1, 16, 128>}, {transform_indices = @transform_4, window_bounds = array<i64: 1, 16, 128>}]} {
    %c0 = arith.constant 0 : index
    %c0_0 = arith.constant 0 : index
    %0 = vector.load %arg3[%c0, %c0_0] : memref<8x128xf32, #tpu.memory_space<vmem>>, vector<8x128xf32>
    %c0_1 = arith.constant 0 : index
    %c0_2 = arith.constant 0 : index
    %c0_3 = arith.constant 0 : index
    %1 = vector.load %arg1[%c0_1, %c0_2, %c0_3] : memref<1x16x128xf32, #tpu.memory_space<vmem>>, vector<1x16x128xf32>
    %2 = vector.shape_cast %1 : vector<1x16x128xf32> to vector<16x128xf32>
    %c0_4 = arith.constant 0 : index
    %c0_5 = arith.constant 0 : index
    %3 = vector.load %arg2[%c0_4, %c0_5] : memref<128x256xf32, #tpu.memory_space<vmem>>, vector<128x256xf32>
    %cst = arith.constant dense<0.000000e+00> : vector<16x256xf32>
    %4 = tpu.matmul %2, %3, %cst {dimension_numbers = #tpu.dot_dimension_numbers<[1], [0], [0], [1], [0, 0, 1, 1], [], []>} : vector<16x128xf32>, vector<128x256xf32>, vector<16x256xf32> -> vector<16x256xf32>
    %5 = vector.extract_strided_slice %4 {offsets = [0, 0], sizes = [16, 128], strides = [1, 1]} : vector<16x256xf32> to vector<16x128xf32>
    %6 = vector.extract_strided_slice %0 {offsets = [0, 0], sizes = [1, 128], strides = [1, 1]} : vector<8x128xf32> to vector<1x128xf32>
    %7 = vector.broadcast %6 : vector<1x128xf32> to vector<16x128xf32>
    %8 = arith.addf %5, %7 : vector<16x128xf32>
    %cst_6 = arith.constant 0.000000e+00 : f32
    %9 = vector.broadcast %cst_6 : f32 to vector<16x128xf32>
    %10 = arith.maximumf %8, %9 : vector<16x128xf32>
    %c0_7 = arith.constant 0 : index
    %c0_8 = arith.constant 0 : index
    %c0_9 = arith.constant 0 : index
    %11 = vector.load %arg4[%c0_7, %c0_8, %c0_9] : memref<1x16x128xf32, #tpu.memory_space<vmem>>, vector<1x16x128xf32>
    %12 = vector.shape_cast %11 : vector<1x16x128xf32> to vector<16x128xf32>
    %13 = vector.shape_cast %10 : vector<16x128xf32> to vector<1x16x128xf32>
    tpu.vector_store %arg4[%c0_7, %c0_8, %c0_9], %13 {strides = array<i32>} : memref<1x16x128xf32, #tpu.memory_space<vmem>>, vector<1x16x128xf32>,
    %14 = vector.extract_strided_slice %4 {offsets = [0, 128], sizes = [16, 128], strides = [1, 1]} : vector<16x256xf32> to vector<16x128xf32>
    %15 = vector.extract_strided_slice %0 {offsets = [1, 0], sizes = [1, 128], strides = [1, 1]} : vector<8x128xf32> to vector<1x128xf32>
    %16 = vector.broadcast %15 : vector<1x128xf32> to vector<16x128xf32>
    %17 = arith.addf %14, %16 : vector<16x128xf32>
    %cst_10 = arith.constant 0.000000e+00 : f32
    %18 = vector.broadcast %cst_10 : f32 to vector<16x128xf32>
    %19 = arith.maximumf %17, %18 : vector<16x128xf32>
    %c0_11 = arith.constant 0 : index
    %c0_12 = arith.constant 0 : index
    %c0_13 = arith.constant 0 : index
    %20 = vector.load %arg5[%c0_11, %c0_12, %c0_13] : memref<1x16x128xf32, #tpu.memory_space<vmem>>, vector<1x16x128xf32>
    %21 = vector.shape_cast %20 : vector<1x16x128xf32> to vector<16x128xf32>
    %22 = vector.shape_cast %19 : vector<16x128xf32> to vector<1x16x128xf32>
    tpu.vector_store %arg5[%c0_11, %c0_12, %c0_13], %22 {strides = array<i32>} : memref<1x16x128xf32, #tpu.memory_space<vmem>>, vector<1x16x128xf32>,
    return
  }
  func.func @transform_0(%arg0: i32) -> (i32, i32, i32) {
    %c0_i32 = arith.constant 0 : i32
    %c0_i32_0 = arith.constant 0 : i32
    %c0_i32_1 = arith.constant 0 : i32
    return %arg0, %c0_i32, %c0_i32_0 : i32, i32, i32
  }
  func.func @transform_1(%arg0: i32) -> (i32, i32) {
    %c0_i32 = arith.constant 0 : i32
    %c0_i32_0 = arith.constant 0 : i32
    %c0_i32_1 = arith.constant 0 : i32
    return %c0_i32, %c0_i32_0 : i32, i32
  }
  func.func @transform_2(%arg0: i32) -> (i32, i32) {
    %c0_i32 = arith.constant 0 : i32
    %c0_i32_0 = arith.constant 0 : i32
    %c0_i32_1 = arith.constant 0 : i32
    return %c0_i32, %c0_i32_0 : i32, i32
  }
  func.func @transform_3(%arg0: i32) -> (i32, i32, i32) {
    %c0_i32 = arith.constant 0 : i32
    %c0_i32_0 = arith.constant 0 : i32
    %c0_i32_1 = arith.constant 0 : i32
    return %arg0, %c0_i32, %c0_i32_0 : i32, i32, i32
  }
  func.func @transform_4(%arg0: i32) -> (i32, i32, i32) {
    %c0_i32 = arith.constant 0 : i32
    %c0_i32_0 = arith.constant 0 : i32
    %c0_i32_1 = arith.constant 0 : i32
    return %arg0, %c0_i32, %c0_i32_0 : i32, i32, i32
  }
}

</mosaic_0001>

<bundles_post_ra>
// kernel: tpu_custom_call.1
= control target key start
LH: loop header
LB: loop body
LE: loop exit
PB: predicated region body
PF: predicated region fallthrough
CT: control target
= control target key end

     0   :  { %10 = vsyncpa [#allocation3], 0  ;;  %s1204_s0 = inlined_call_operand.hbm [shape: f32[2,16,128], index: 0, kind: input, shape index: {}]   ;;  %s1205_s1 = inlined_call_operand.hbm [shape: f32[128,256], index: 1, kind: input, shape index: {}]   ;;  %s1206_s2 = inlined_call_operand.hbm [shape: f32[8,128], index: 2, kind: input, shape index: {}]   ;;  %s1207_s3 = inlined_call_operand.hbm [shape: f32[2,16,128], index: 3, kind: output, shape index: {0}]   ;;  %s1208_s4 = inlined_call_operand.hbm [shape: f32[2,16,128], index: 4, kind: output, shape index: {1}]  }
   0x1   :  { %12 = vsyncpa [#allocation3 + $0x1], 0 }
   0x2   :  { %13 = vsyncpa [#allocation6], 0 }
   0x3   :  { %14 = vsyncpa [#allocation4], 0 }
   0x4   :  { %16 = vsyncpa [#allocation4 + $0x1], 0 }
   0x5   :  { %17 = vsyncpa [#allocation10], 0 }
   0x6   :  { %19 = vsyncpa [#allocation10 + $0x1], 0  ;;  %s924_s15 = smov 0   ;;  %s926_s16 = smov 0  }
   0x7   :  { %s928_s17 = smov 0   ;;  %s930_s18 = smov 0  }
   0x8 LB: > { %s945_s19 = sadd.s32 4294967295, %s885_s18   ;;  %s545_s20 = sadd.s32 4294967294, %s885_s18   ;;  %s885_s18 = sphi %s930_s18, %s1228_s18   ;;  %s881_s17 = sphi %s928_s17, %s1227_s17   ;;  %s877_s16 = sphi %s926_s16, %s1226_s16   ;;  %s873_s15 = sphi %s924_s15, %s1225_s15  }
   0x9   : > { %p45_p0 = scmp.ne.s32.totalorder %s877_s16, %s873_s15  ;;  %p1209_p1 = scmp.eq.s32.totalorder %s945_s19, 0 }
   0xa   : > { %p117_p3 = scmp.eq.s32.totalorder %s545_s20, 1  ;;  %p546_p5 = scmp.ge.s32.totalorder %s885_s18, 1 }
   0xb   : > { %p954_p4 = por %p1209_p1, %p45_p0  ;;  %p150_p7 = scmp.lt.s32.totalorder %s885_s18, 3 }
   0xc   : > { %p959_p6 = por %p117_p3, %p45_p0  ;;  %s887_s24 = smov [#allocation5]  }
   0xd   : > { %s1212_s21 = scalar_select %p954_p4, 1, 0 }
   0xe   : > { %s1213_s22 = scalar_select %p959_p6, 1, 0 }
   0xf   : > { %p964_p8 = pnand %p546_p5, %p150_p7  ;;  %s162_s25 = sshll.u32 %s887_s24, 4  ;;  %s968_s25 = int_to_ptr.vmem [resolvable:$true] %s162_s25 }
  0x10   : > { %s888_s27 = smov [#allocation7]   ;;  %s697_s5 = scalar_lea.hbm %s1205_s1, 4096 }
  0x11   : > { %p632_p9 = pneg %p964_p8  ;;  %s176_s28 = sshll.u32 %s888_s27, 4  ;;  %s979_s28 = int_to_ptr.vmem [resolvable:$true] %s176_s28 }
  0x12   : > { %p698_p12 = scmp.ne.s32.totalorder %s1205_s1, %s697_s5  ;;  %p704_p5 = scmp.lt.u32.totalorder %s697_s5, %s1205_s1 }
  0x13   : > { %p975_p11 = pnand %p632_p9, %p1209_p1 }
  0x15   : > { %p699_p13 = pneg %p975_p11 }
  0x17   : > { %p700_p0 = pnand %p699_p13, %p698_p12 }
  0x19   : > { %p701_p3 = pneg %p700_p0 }
  0x1b   : > { %p706_p7 = pnand %p704_p5, %p701_p3 }
  0x1d   : > { %709 = shalt.err (!%p706_p7)
}
  0x1e   : > { %s710_s10 = scalar_lea.vmem %s968_s25, 4096  ;;  %p718_p2 = scmp.lt.s32.totalorder %s968_s25, %s968_s25 }
  0x1f   : > { %p711_p9 = scmp.ne.s32.totalorder %s968_s25, %s710_s10  ;;  %p719_p12 = scmp.lt.s32.totalorder %s710_s10, %s710_s10 }
  0x21   : > { %p713_p10 = pnand %p711_p9, %p699_p13  ;;  %p720_p0 = por %p719_p12, %p718_p2 }
  0x23   : > { %p714_p1 = pneg %p713_p10 }
  0x25   : > { %p721_p6 = pnand %p720_p0, %p714_p1 }
  0x27   : > { %724 = shalt.err (!%p721_p6)
}
  0x28   : > { %s889_s11 = smov 256   ;;  %s890_s12 = smov 16  }
  0x29   : > { %635 = dma.hbm_to_vmem [thread:$0]  (!%p975_p11), %s1205_s1, 4096, %s968_s25, [#allocation6], %s889_s11, %s889_s11, %s890_s12  }
  0x2a   : > { %s725_s27 = scalar_lea.hbm %s1206_s2, 128 }
  0x2b   : > { %p726_p2 = scmp.ne.s32.totalorder %s1206_s2, %s725_s27  ;;  %p732_p10 = scmp.lt.u32.totalorder %s725_s27, %s1206_s2 }
  0x2d   : > { %p728_p1 = pnand %p726_p2, %p699_p13 }
  0x2f   : > { %p729_p6 = pneg %p728_p1 }
  0x31   : > { %p734_p3 = pnand %p732_p10, %p729_p6 }
  0x33   : > { %737 = shalt.err (!%p734_p3)
}
  0x34   : > { %s738_s25 = scalar_lea.vmem %s979_s28, 128  ;;  %p746_p12 = scmp.lt.s32.totalorder %s979_s28, %s979_s28 }
  0x35   : > { %p739_p5 = scmp.ne.s32.totalorder %s979_s28, %s738_s25  ;;  %p747_p0 = scmp.lt.s32.totalorder %s738_s25, %s738_s25 }
  0x37   : > { %p741_p7 = pnand %p739_p5, %p699_p13  ;;  %p748_p2 = por %p747_p0, %p746_p12 }
  0x39   : > { %p742_p9 = pneg %p741_p7 }
  0x3b   : > { %p749_p1 = pnand %p748_p2, %p742_p9 }
  0x3d   : > { %752 = shalt.err (!%p749_p1)
}
  0x3e   : > { %638 = dma.hbm_to_vmem [thread:$0]  (!%p975_p11), %s1206_s2, 128, %s979_s28, [#allocation6]  }
  0x3f   : > { %s1034_s9 = sadd.s32 1, %s885_s18   ;;  %s32_s26 = sadd.s32 1, %s881_s17 }
  0x40   : > { %s29_s10 = ssub.s32 %s885_s18, %s1034_s9  ;;  %p39_p13 = scmp.ne.s32.totalorder %s881_s17, %s877_s16 }
  0x41   : > { %p30_p6 = scmp.eq.s32.totalorder %s29_s10, 0  ;;  %p40_p10 = scmp.eq.s32.totalorder %s885_s18, 0 }
  0x42   : > { %p1216_p3 = scmp.eq.s32.totalorder %s945_s19, 1  ;;  %p652_p7 = scmp.lt.s32.totalorder %s885_s18, 2 }
  0x43   : > { %s1050_s12 = scalar_select %p30_p6, %s881_s17, %s32_s26  }
  0x44   : > { %p1044_p5 = por %p1216_p3, %p39_p13  ;;  %p41_p9 = por %p40_p10, %p39_p13 }
  0x45   : > { %s187_s13 = sand.u32 1, %s881_s17   ;;  %s567_s28 = sshll.u32 %s885_s18, 8 }
  0x46   : > { %s1217_s11 = scalar_select %p1044_p5, 1, 0 }
  0x47   : > { %s550_s14 = sshll.u32 %s187_s13, 4  ;;  %s1057_s27 = scalar_lea.hbm %s1204_s0, %s567_s28 }
  0x48   : > { %s191_s29 = scalar_lea.vmem [#allocation2], %s550_s14  ;;  %p1061_p11 = pnand %p652_p7, %p41_p9 }
  0x49   : > { %s198_s30 = sshll.u32 %s191_s29, 4  ;;  %s1065_s6 = scalar_lea.sflag [#allocation3], %s187_s13  ;;  %s1059_s30 = int_to_ptr.vmem [resolvable:$true] %s198_s30 }
  0x4a   : > { %s753_s25 = scalar_lea.hbm %s1057_s27, 256  ;;  %p755_p0 = pneg %p1061_p11 }
  0x4b   : > { %p754_p12 = scmp.ne.s32.totalorder %s1057_s27, %s753_s25  ;;  %s758_s26 = scalar_lea.hbm %s1204_s0, 512 }
  0x4c   : > { %p759_p13 = scmp.lt.u32.totalorder %s1057_s27, %s1204_s0  ;;  %p760_p6 = scmp.lt.u32.totalorder %s758_s26, %s753_s25 }
  0x4d   : > { %p756_p2 = pnand %p755_p0, %p754_p12  ;;  %p762_p3 = scmp.lt.u32.totalorder %s753_s25, %s1057_s27 }
  0x4e   : > { %p761_p10 = por %p760_p6, %p759_p13 }
  0x4f   : > { %p757_p1 = pneg %p756_p2 }
  0x50   : > { %p763_p7 = por %p762_p3, %p761_p10 }
  0x52   : > { %p764_p9 = pnand %p763_p7, %p757_p1 }
  0x54   : > { %767 = shalt.err (!%p764_p9)
}
  0x55   : > { %s768_s13 = scalar_lea.vmem %s1059_s30, 256  ;;  %s891_s28 = smov [#allocation2]  }
  0x56   : > { %p769_p12 = scmp.ne.s32.totalorder %s1059_s30, %s768_s13  ;;  %s773_s20 = sshll.u32 %s891_s28, 4  ;;  %s774_s20 = int_to_ptr.vmem [resolvable:$false] %s773_s20 }
  0x57   : > { %s775_s24 = scalar_lea.vmem %s774_s20, 512  ;;  %p776_p4 = scmp.lt.s32.totalorder %s1059_s30, %s774_s20 }
  0x58   : > { %p771_p2 = pnand %p769_p12, %p755_p0  ;;  %p777_p13 = scmp.lt.s32.totalorder %s775_s24, %s768_s13 }
  0x5a   : > { %p772_p5 = pneg %p771_p2  ;;  %p778_p6 = por %p777_p13, %p776_p4 }
  0x5c   : > { %p779_p10 = pnand %p778_p6, %p772_p5 }
  0x5e   : > { %782 = shalt.err (!%p779_p10)
}
  0x5f   : > { %s892_s29 = smov 128   ;;  %s893_s25 = smov 8  }
  0x60   : > { %642 = dma.hbm_to_vmem [thread:$0]  (!%p1061_p11), %s1057_s27, 256, %s1059_s30, %s1065_s6, %s892_s29, %s892_s29, %s893_s25  }
  0x61   : > { %210 = sbr.rel (%p964_p8) target bundleno = 398 (0x18e), region = 32  ;;  %s1096_s7 = sand.u32 (!%p964_p8), 1, %s877_s16  }
  0x62   : > { %s1099_s8 = sshll.u32 (!%p964_p8), %s1096_s7, 4  ;;  %s213_s26 = scalar_lea.sflag (!%p964_p8), [#allocation3], %s1096_s7 }
  0x63   : > { %s216_s10 = scalar_lea.vmem (!%p964_p8), [#allocation2], %s1099_s8  ;;  %p1219_p4 = scmp.ne.s32.totalorder (!%p964_p8), %s1212_s21, 0 }
  0x68   : > { %856 = dma.done.wait (%p1219_p4), %s213_s26, 256  }
  0x69   : > { %858 = vsyncadd (%p1219_p4), %s213_s26, 4294967040  ;;  %p1220_p5 = scmp.eq.s32.totalorder %s945_s19, 0 }
  0x6b   : > { %860 = dma.done.wait (%p1220_p5), [#allocation6], 4224   ;;  %p1221_p8 = pmov %p1220_p5 }
  0x6c   : > { %v894_v0 = vmov 0.0   ;;  %v258_v1 = vld [vmem:[#allocation5 + $0x8] sm:$0xff]  ;;  %v260_v2 = vld [vmem:[#allocation5 + $0x18] sm:$0xff]  ;;  %v257_v3 = vld [vmem:[#allocation5] sm:$0xff]  ;;  %v366_v51 = vlaneseq  ;;  %s246_s21 = scalar_lea.vmem [#allocation8], %s1099_s8  ;;  %s253_s27 = scalar_lea.vmem [#allocation9], %s1099_s8 }
  0x6d   : > { %862 = vsyncadd (%p1221_p8), [#allocation6], 4294963072  ;;  %353 = vmatprep.mubr.f32.mxu0 %v894_v0  ;;  %359 = vmatprep.mubr.f32.mxu1 %v894_v0  ;;  %v570_v4 = vpack.c.bf16 %v260_v2, %v258_v1  ;;  %v259_v5 = vld [vmem:[#allocation5 + $0x10] sm:$0xff]  ;;  %v262_v6 = vld [vmem:[#allocation5 + $0x28] sm:$0xff]  ;;  %s405_s23 = sshll.u32 %s246_s21, 4  ;;  %s421_s30 = sshll.u32 %s253_s27, 4  ;;  %s1118_s23 = int_to_ptr.vmem [resolvable:$true] %s405_s23  ;;  %s1120_s30 = int_to_ptr.vmem [resolvable:$true] %s421_s30 }
  0x6e   : > { %v264_v7 = vld [vmem:[#allocation5 + $0x38] sm:$0xff]  ;;  %v572_v8 = vpack.c.bf16 %v259_v5, %v257_v3  ;;  %v261_v10 = vld [vmem:[#allocation5 + $0x20] sm:$0xff]  ;;  %v263_v11 = vld [vmem:[#allocation5 + $0x30] sm:$0xff]  ;;  %v367_v52 = vshrl.u32 %v366_v51, 7  ;;  %s568_s5 = sshll.u32 %s945_s19, 8  ;;  %s387_s24 = scalar_lea.sflag [#allocation4], %s1096_s7 }
  0x6f   : > { %v574_v9 = vpack.c.bf16 %v264_v7, %v262_v6  ;;  %v266_v12 = vld [vmem:[#allocation5 + $0x48] sm:$0xff]  ;;  %571 = vmatprep.subr.bf16.mxu0 %v570_v4  ;;  %602 = vmatprep.subr.bf16.mxu1 %v570_v4  ;;  %v268_v13 = vld [vmem:[#allocation5 + $0x58] sm:$0xff]  ;;  %v576_v14 = vpack.c.bf16 %v263_v11, %v261_v10  ;;  %v265_v16 = vld [vmem:[#allocation5 + $0x40] sm:$0xff]  ;;  %s1125_s19 = scalar_lea.hbm %s1207_s3, %s568_s5  ;;  %s1130_s20 = scalar_lea.hbm %s1208_s4, %s568_s5 }
  0x70   : > { %573 = vmatpush1.bf16.msra.mxu0 %v572_v8  ;;  %610 = vmatpush1.bf16.msra.mxu1 %v572_v8  ;;  %v578_v15 = vpack.c.bf16 %v268_v13, %v266_v12  ;;  %v267_v17 = vld [vmem:[#allocation5 + $0x50] sm:$0xff]  ;;  %v270_v18 = vld [vmem:[#allocation5 + $0x68] sm:$0xff]  ;;  %v272_v19 = vld [vmem:[#allocation5 + $0x78] sm:$0xff]  ;;  %v368_v53 = vsub.s32 0, %v367_v52  ;;  %v378_v55 = vsub.s32 1, %v367_v52  ;;  %s783_s29 = scalar_lea.vmem %s1118_s23, 256 }
  0x71   : > { %575 = vmatprep.subr.bf16.mxu0 %v574_v9  ;;  %603 = vmatprep.subr.bf16.mxu1 %v574_v9  ;;  %v580_v20 = vpack.c.bf16 %v267_v17, %v265_v16  ;;  %v582_v21 = vpack.c.bf16 %v272_v19, %v270_v18  ;;  %v269_v22 = vld [vmem:[#allocation5 + $0x60] sm:$0xff]  ;;  %v271_v23 = vld [vmem:[#allocation5 + $0x70] sm:$0xff]  ;;  %v274_v24 = vld [vmem:[#allocation5 + $0x88] sm:$0xff]  ;;  %p784_p11 = scmp.ne.s32.totalorder %s1118_s23, %s783_s29  ;;  %p1222_p0 = scmp.ne.s32.totalorder %s1217_s11, 0 }
  0x72   : > { %v276_v25 = vld [vmem:[#allocation5 + $0x98] sm:$0xff]  ;;  %v584_v26 = vpack.c.bf16 %v271_v23, %v269_v22  ;;  %v273_v28 = vld [vmem:[#allocation5 + $0x80] sm:$0xff]  ;;  %v275_v29 = vld [vmem:[#allocation5 + $0x90] sm:$0xff]  ;;  %s895_s25 = smov [#allocation8]  }
  0x73   : > { %v586_v27 = vpack.c.bf16 %v276_v25, %v274_v24  ;;  %v278_v30 = vld [vmem:[#allocation5 + $0xa8] sm:$0xff]  ;;  %v280_v31 = vld [vmem:[#allocation5 + $0xb8] sm:$0xff]  ;;  %v588_v32 = vpack.c.bf16 %v275_v29, %v273_v28  ;;  %v277_v34 = vld [vmem:[#allocation5 + $0xa0] sm:$0xff]  ;;  %p785_p1 = pnand %p784_p11, %p1222_p0  ;;  %s787_s8 = sshll.u32 %s895_s25, 4  ;;  %s788_s8 = int_to_ptr.vmem [resolvable:$false] %s787_s8 }
  0x74   : > { %577 = vmatpush1.bf16.msra.mxu0 %v576_v14  ;;  %611 = vmatpush1.bf16.msra.mxu1 %v576_v14  ;;  %v590_v33 = vpack.c.bf16 %v280_v31, %v278_v30  ;;  %v279_v35 = vld [vmem:[#allocation5 + $0xb0] sm:$0xff]  ;;  %v282_v36 = vld [vmem:[#allocation5 + $0xc8] sm:$0xff]  ;;  %v284_v37 = vld [vmem:[#allocation5 + $0xd8] sm:$0xff]  ;;  %s789_s26 = scalar_lea.vmem %s788_s8, 512  ;;  %p790_p7 = scmp.lt.s32.totalorder %s1118_s23, %s788_s8 }
  0x75   : > { %579 = vmatprep.subr.bf16.mxu0 %v578_v15  ;;  %604 = vmatprep.subr.bf16.mxu1 %v578_v15  ;;  %v592_v38 = vpack.c.bf16 %v279_v35, %v277_v34  ;;  %v594_v39 = vpack.c.bf16 %v284_v37, %v282_v36  ;;  %v281_v40 = vld [vmem:[#allocation5 + $0xc0] sm:$0xff]  ;;  %v283_v41 = vld [vmem:[#allocation5 + $0xd0] sm:$0xff]  ;;  %v286_v42 = vld [vmem:[#allocation5 + $0xe8] sm:$0xff]  ;;  %p786_p3 = pneg %p785_p1  ;;  %p791_p9 = scmp.lt.s32.totalorder %s789_s26, %s783_s29 }
  0x76   : > { %v288_v43 = vld [vmem:[#allocation5 + $0xf8] sm:$0xff]  ;;  %v596_v44 = vpack.c.bf16 %v283_v41, %v281_v40  ;;  %v285_v46 = vld [vmem:[#allocation5 + $0xe0] sm:$0xff]  ;;  %v287_v47 = vld [vmem:[#allocation5 + $0xf0] sm:$0xff] }
  0x77   : > { %v598_v45 = vpack.c.bf16 %v288_v43, %v286_v42  ;;  %v600_v48 = vpack.c.bf16 %v287_v47, %v285_v46  ;;  %v255_v49 = vld [vmem:[%s216_s10] sm:$0xff]  ;;  %v256_v50 = vld [vmem:[%s216_s10 + $0x8] sm:$0xff]  ;;  %p792_p12 = por %p791_p9, %p790_p7 }
  0x78   : > { %581 = vmatpush1.bf16.msra.mxu0 %v580_v20  ;;  %612 = vmatpush1.bf16.msra.mxu1 %v580_v20  ;;  %v254_v54 = vld [vmem:[#allocation7] sm:$0xff] }
  0x79   : > { %583 = vmatprep.subr.bf16.mxu0 %v582_v21  ;;  %605 = vmatprep.subr.bf16.mxu1 %v582_v21  ;;  %v369_v56 = vrot.slane %v254_v54, %v368_v53  ;;  %v379_v57 = vrot.slane %v254_v54, %v378_v55  ;;  %p793_p2 = pnand %p792_p12, %p786_p3 }
  0x7c   : > { %585 = vmatpush1.bf16.msra.mxu0 %v584_v26  ;;  %613 = vmatpush1.bf16.msra.mxu1 %v584_v26 }
  0x7d   : > { %587 = vmatprep.subr.bf16.mxu0 %v586_v27  ;;  %606 = vmatprep.subr.bf16.mxu1 %v586_v27 }
  0x80   : > { %589 = vmatpush1.bf16.msra.mxu0 %v588_v32  ;;  %614 = vmatpush1.bf16.msra.mxu1 %v588_v32 }
  0x81   : > { %591 = vmatprep.subr.bf16.mxu0 %v590_v33  ;;  %607 = vmatprep.subr.bf16.mxu1 %v590_v33 }
  0x84   : > { %593 = vmatpush1.bf16.msra.mxu0 %v592_v38  ;;  %615 = vmatpush1.bf16.msra.mxu1 %v592_v38 }
  0x85   : > { %595 = vmatprep.subr.bf16.mxu0 %v594_v39  ;;  %608 = vmatprep.subr.bf16.mxu1 %v594_v39 }
  0x88   : > { %597 = vmatpush1.bf16.msra.mxu0 %v596_v44  ;;  %616 = vmatpush1.bf16.msra.mxu1 %v596_v44 }
  0x89   : > { %599 = vmatprep.subr.bf16.mxu0 %v598_v45  ;;  %609 = vmatprep.subr.bf16.mxu1 %v598_v45 }
  0x8c   : > { %601 = vmatpush1.bf16.msra.mxu0 %v600_v48  ;;  %617 = vmatpush1.bf16.msra.mxu1 %v600_v48 }
  0x8f   : > { %354 = vmatmul.mubr.f32.vlgmr.msra.gmra.mrb[0].mxu0 %v255_v49  ;;  %360 = vmatmul.mubr.f32.vlgmr.msra.gmra.mrb[0].mxu1 %v256_v50 }
 0x162   : > { %v355_v58 = vpop.f32.mrb[0].mxu0  ;;  %v361_v59 = vpop.f32.mrb[0].mxu1 }
 0x163   : > { %v370_v60 = vadd.f32 %v369_v56, %v355_v58  ;;  %v371_v61 = vadd.f32 %v369_v56, %v361_v59  ;;  %v357_v62 = vpop.f32.mrb[1].mxu0  ;;  %v363_v63 = vpop.f32.mrb[1].mxu1 }
 0x164   : > { %v380_v0 = vadd.f32 %v379_v57, %v357_v62  ;;  %v381_v1 = vadd.f32 %v379_v57, %v363_v63 }
 0x165   : > { %v372_v2 = vmax.f32 %v370_v60, 0.0  ;;  %v373_v3 = vmax.f32 %v371_v61, 0.0 }
 0x166   : > { %v382_v4 = vmax.f32 %v380_v0, 0.0  ;;  %v383_v5 = vmax.f32 %v381_v1, 0.0 }
 0x167   : > { %374 = vst [vmem:[%s246_s21] sm:$0xff] %v372_v2  ;;  %375 = vst [vmem:[%s246_s21 + $0x8] sm:$0xff] %v373_v3 }
 0x168   : > { %384 = vst [vmem:[%s253_s27] sm:$0xff] %v382_v4  ;;  %385 = vst [vmem:[%s253_s27 + $0x8] sm:$0xff] %v383_v5 }
 0x169   : > { %796 = shalt.err (!%p793_p2)
}
 0x16a   : > { %s797_s10 = scalar_lea.hbm %s1125_s19, 256  ;;  %s801_s5 = scalar_lea.hbm %s1207_s3, 512 }
 0x16b   : > { %p798_p13 = scmp.ne.s32.totalorder %s1125_s19, %s797_s10  ;;  %p802_p4 = scmp.lt.u32.totalorder %s1125_s19, %s1207_s3 }
 0x16c   : > { %p803_p5 = scmp.lt.u32.totalorder %s801_s5, %s797_s10  ;;  %p805_p11 = scmp.lt.u32.totalorder %s797_s10, %s1125_s19 }
 0x16d   : > { %p799_p6 = pnand %p798_p13, %p1222_p0 }
 0x16e   : > { %p804_p8 = por %p803_p5, %p802_p4 }
 0x16f   : > { %p800_p10 = pneg %p799_p6 }
 0x170   : > { %p806_p1 = por %p805_p11, %p804_p8 }
 0x172   : > { %p807_p3 = pnand %p806_p1, %p800_p10 }
 0x174   : > { %810 = shalt.err (!%p807_p3)
}
 0x175   : > { %s896_s13 = smov 128   ;;  %s897_s28 = smov 8  }
 0x176   : > { %628 = dma.vmem_to_hbm [thread:$0]  (%p1222_p0), %s1118_s23, 256, %s1125_s19, %s387_s24, %s896_s13, %s896_s13, %s897_s28  }
 0x177   : > { %s392_s29 = scalar_lea.sflag [#allocation10], %s1096_s7  ;;  %s811_s25 = scalar_lea.vmem %s1120_s30, 256 }
 0x178   : > { %p812_p7 = scmp.ne.s32.totalorder %s1120_s30, %s811_s25  ;;  %s898_s8 = smov [#allocation9]  }
 0x179   : > { %s815_s26 = sshll.u32 %s898_s8, 4  ;;  %s816_s26 = int_to_ptr.vmem [resolvable:$false] %s815_s26 }
 0x17a   : > { %p813_p9 = pnand %p812_p7, %p1222_p0  ;;  %s817_s10 = scalar_lea.vmem %s816_s26, 512 }
 0x17b   : > { %p818_p2 = scmp.lt.s32.totalorder %s1120_s30, %s816_s26  ;;  %p819_p13 = scmp.lt.s32.totalorder %s817_s10, %s811_s25 }
 0x17c   : > { %p814_p12 = pneg %p813_p9 }
 0x17d   : > { %p820_p6 = por %p819_p13, %p818_p2 }
 0x17f   : > { %p821_p10 = pnand %p820_p6, %p814_p12 }
 0x181   : > { %824 = shalt.err (!%p821_p10)
}
 0x182   : > { %s825_s23 = scalar_lea.hbm %s1130_s20, 256  ;;  %s829_s21 = scalar_lea.hbm %s1208_s4, 512 }
 0x183   : > { %p826_p4 = scmp.ne.s32.totalorder %s1130_s20, %s825_s23  ;;  %p830_p11 = scmp.lt.u32.totalorder %s1130_s20, %s1208_s4 }
 0x184   : > { %p831_p1 = scmp.lt.u32.totalorder %s829_s21, %s825_s23  ;;  %p833_p7 = scmp.lt.u32.totalorder %s825_s23, %s1130_s20 }
 0x185   : > { %p827_p5 = pnand %p826_p4, %p1222_p0 }
 0x186   : > { %p832_p3 = por %p831_p1, %p830_p11 }
 0x187   : > { %p828_p8 = pneg %p827_p5 }
 0x188   : > { %p834_p9 = por %p833_p7, %p832_p3 }
 0x18a   : > { %p835_p12 = pnand %p834_p9, %p828_p8 }
 0x18c   : > { %838 = shalt.err (!%p835_p12)
}
 0x18d   : > { %629 = dma.vmem_to_hbm [thread:$0]  (%p1222_p0), %s1120_s30, 256, %s1130_s20, %s392_s29, %s896_s13, %s896_s13, %s897_s28  }
 0x18e PF: > { %s436_s6 = sand.u32 1, %s873_s15   ;;  %p1223_p2 = scmp.ne.s32.totalorder %s1213_s22, 0 }
 0x18f   : > { %p1224_p13 = scmp.ge.s32.totalorder %s885_s18, 2  ;;  %s437_s14 = scalar_lea.sflag [#allocation4], %s436_s6 }
 0x191   : > { %p644_p6 = pnand %p1224_p13, %p1223_p2 }
 0x193   : > { %864 = dma.done.wait (!%p644_p6), %s437_s14, 256  }
 0x194   : > { %866 = vsyncadd (!%p644_p6), %s437_s14, 4294967040  ;;  %s446_s11 = scalar_lea.sflag [#allocation10], %s436_s6 }
 0x195   : > { %868 = dma.done.wait (!%p644_p6), %s446_s11, 256  }
 0x196   : > { %870 = vsyncadd (!%p644_p6), %s446_s11, 4294967040  ;;  %p22_p0 = scmp.ge.s32.totalorder %s1034_s9, 4   ;;  %s1225_s15 = smov %s877_s16 }
 0x197   : > { %s1226_s16 = smov %s881_s17  ;;  %s1227_s17 = smov %s1050_s12 }
 0x198   : > { %s1228_s18 = smov %s1034_s9  ;;  %24 = sbr.rel (!%p22_p0) target bundleno = 8 (0x8), region = 102 }
 0x19f   :  { %451 = vsyncpa [#allocation3], 1 }
 0x1a0   :  { %453 = vsyncpa [#allocation3 + $0x1], 1 }
 0x1a1   :  { %454 = vsyncpa [#allocation6], 1 }
 0x1a2   :  { %455 = vsyncpa [#allocation4], 1 }
 0x1a3   :  { %457 = vsyncpa [#allocation4 + $0x1], 1 }
 0x1a4   :  { %458 = vsyncpa [#allocation10], 1 }
 0x1a5   :  { %460 = vsyncpa [#allocation10 + $0x1], 1 }

</bundles_post_ra>
